<compile_context>
chip_gen: v6e
topology: v6e:2x2x1
jax: 0.10.0
libtpu: 0.0.40
codegen_flags: <defaults>
</compile_context>

<pallas_src>
import functools

import jax
import jax.numpy as jnp
from jax.experimental import pallas as pl
from jax.experimental.pallas import tpu as pltpu


def _convgru_kernel(xf_ref, hf_ref, wih_ref, whh_ref, bih_ref, bhh_ref,
                    out_ref, colx_ref, colh_ref, *,
                    kh, kw, rkh, rkw, c_in, hc, wf, n_full):
    """One batch element per grid step (channels on sublanes, pixels on lanes).

    xf_ref : (1, Cin, (Hp+1)*Wf)   bf16  zero-padded input, rows flattened
    hf_ref : (1, hc,  (Hph+1)*Wf)  bf16  zero-padded hidden, rows flattened
    wih_ref: (3*hc, kh*kw*Cin)     bf16  gate-stacked im2col weights (z, r, n rows)
    whh_ref: (3*hc, rkh*rkw*hc)    bf16
    bih_ref/bhh_ref: (3*hc, 1)     f32
    out_ref: (1, hc, n_full)       n_full = h_out * Wf  (wrap-around cols included)
    colx_ref/colh_ref: VMEM im2col scratch, (K, n_full) bf16
    """
    xf = xf_ref[0]                       # (Cin, Lx) bf16
    hf = hf_ref[0]                       # (hc,  Lh) bf16

    # --- im2col via contiguous lane slices of the row-flattened images.
    # The "full" conv output has the same row pitch (wf) as the padded image,
    # so each tap is a single contiguous slice: no per-tap reshape/relayout. ---
    for dy in range(kh):
        for dx in range(kw):
            t = dy * kw + dx
            off = dy * wf + dx
            colx_ref[t * c_in:(t + 1) * c_in, :] = xf[:, off:off + n_full]
    for dy in range(rkh):
        for dx in range(rkw):
            t = dy * rkw + dx
            off = dy * wf + dx
            colh_ref[t * hc:(t + 1) * hc, :] = hf[:, off:off + n_full]

    # --- 2 MXU matmuls (all three gates stacked on M), f32 accumulation. ---
    ih = jnp.dot(wih_ref[...], colx_ref[...],
                 preferred_element_type=jnp.float32) + bih_ref[...]
    hh = jnp.dot(whh_ref[...], colh_ref[...],
                 preferred_element_type=jnp.float32) + bhh_ref[...]

    z = jax.nn.sigmoid(ih[:hc] + hh[:hc])
    r = jax.nn.sigmoid(ih[hc:2 * hc] + hh[hc:2 * hc])
    n = jnp.tanh(ih[2 * hc:] + r * hh[2 * hc:])

    # h_prev is exactly the centre tap of the "same"-padded hidden im2col,
    # so no second hidden-state DMA / window copy is needed.
    t_c = (rkh // 2) * rkw + (rkw // 2)
    h_prev = colh_ref[t_c * hc:(t_c + 1) * hc, :].astype(jnp.float32)

    out_ref[0] = ((1.0 - z) * n + z * h_prev).astype(out_ref.dtype)


def convgru2d_cell(x_nchw, w_ih, w_hh, b_ih, b_hh, *,
                   kernel_size, stride=(1, 1), padding=(0, 0),
                   recurrent_kernel_size=(3, 3), hx_nchw=None):
    """Pallas ConvGRU2DCell forward. x_nchw: (B, Cin, H, W) float32. Returns NCHW."""
    kh, kw = kernel_size
    sh, sw = stride
    ph, pw = padding
    rkh, rkw = recurrent_kernel_size
    rph, rpw = rkh // 2, rkw // 2

    B, c_in, H, W = x_nchw.shape
    hc = w_ih.shape[0] // 3
    assert c_in == hc, "module requires input_channels == hidden_channels"
    # TODO(synk): general strided ih-conv would need strided lane slices (pl.ds stride).
    assert (sh, sw) == (1, 1), "this Pallas kernel supports stride=(1,1)"
    assert rkh % 2 == 1 and rkw % 2 == 1, "recurrent kernel must be odd-sized"

    h_out = (H - kh + 2 * ph) // sh + 1
    w_out = (W - kw + 2 * pw) // sw + 1

    if hx_nchw is None:
        hx_nchw = jnp.zeros((B, hc, h_out, w_out), x_nchw.dtype)

    # Common row pitch for both "full" conv outputs; valid columns are [0, w_out).
    wf = max(W + 2 * pw, w_out + 2 * rpw)
    hp_x = H + 2 * ph              # padded input height  (== h_out + kh - 1)
    hp_h = h_out + rkh - 1         # padded hidden height
    n_full = h_out * wf

    # ---- glue: zero-pad (one extra bottom row for wrap-around slack),
    #            flatten rows to pitch wf, cast matmul operands to bf16. ----
    xpad = jnp.pad(x_nchw.astype(jnp.bfloat16),
                   ((0, 0), (0, 0), (ph, ph + 1), (pw, wf - W - pw)))
    hpad = jnp.pad(hx_nchw.astype(jnp.bfloat16),
                   ((0, 0), (0, 0), (rph, rph + 1), (rpw, wf - w_out - rpw)))
    lx = (hp_x + 1) * wf
    lh = (hp_h + 1) * wf
    xflat = xpad.reshape(B, c_in, lx)
    hflat = hpad.reshape(B, hc, lh)

    # OIHW -> gate-stacked im2col weights: rows = 3*hc output channels (z,r,n),
    # columns ordered (dy, dx, c) to match the im2col row order in the kernel.
    kx = kh * kw * c_in
    krec = rkh * rkw * hc
    wih = jnp.transpose(w_ih.reshape(3 * hc, c_in, kh, kw),
                        (0, 2, 3, 1)).reshape(3 * hc, kx).astype(jnp.bfloat16)
    whh = jnp.transpose(w_hh.reshape(3 * hc, hc, rkh, rkw),
                        (0, 2, 3, 1)).reshape(3 * hc, krec).astype(jnp.bfloat16)
    bih = b_ih.reshape(3 * hc, 1).astype(jnp.float32)
    bhh = b_hh.reshape(3 * hc, 1).astype(jnp.float32)

    kernel = functools.partial(
        _convgru_kernel, kh=kh, kw=kw, rkh=rkh, rkw=rkw,
        c_in=c_in, hc=hc, wf=wf, n_full=n_full)

    # TODO(synk): for large images add a row-tiled grid axis with a (k-1)-row
    # halo so the pipeline gets >= ~8 steps per batch element.
    out_full = pl.pallas_call(
        kernel,
        out_shape=jax.ShapeDtypeStruct((B, hc, n_full), x_nchw.dtype),
        grid_spec=pltpu.PrefetchScalarGridSpec(
            num_scalar_prefetch=0,
            grid=(B,),
            in_specs=[
                pl.BlockSpec((1, c_in, lx), lambda b: (b, 0, 0)),
                pl.BlockSpec((1, hc, lh), lambda b: (b, 0, 0)),
                pl.BlockSpec((3 * hc, kx), lambda b: (0, 0)),
                pl.BlockSpec((3 * hc, krec), lambda b: (0, 0)),
                pl.BlockSpec((3 * hc, 1), lambda b: (0, 0)),
                pl.BlockSpec((3 * hc, 1), lambda b: (0, 0)),
            ],
            out_specs=pl.BlockSpec((1, hc, n_full), lambda b: (b, 0, 0)),
            scratch_shapes=[
                pltpu.VMEM((kx, n_full), jnp.bfloat16),
                pltpu.VMEM((krec, n_full), jnp.bfloat16),
            ],
        ),
        compiler_params=pltpu.CompilerParams(
            dimension_semantics=("parallel",),
            vmem_limit_bytes=32 * 1024 * 1024,
        ),
    )(xflat, hflat, wih, whh, bih, bhh)

    # Drop the wrap-around columns; result is already NCHW.
    return out_full.reshape(B, hc, h_out, wf)[..., :w_out]


def _reference_convgru(x, h, w_ih, w_hh, b_ih, b_hh, stride, pad_ih, pad_hh, hc):
    """Pure-JAX f32 reference mirroring the PyTorch graph (NCHW)."""
    dn = jax.lax.conv_dimension_numbers(x.shape, w_ih.shape, ("NCHW", "OIHW", "NCHW"))
    ih = jax.lax.conv_general_dilated(
        x, w_ih, window_strides=stride,
        padding=[(pad_ih[0], pad_ih[0]), (pad_ih[1], pad_ih[1])],
        dimension_numbers=dn) + b_ih[None, :, None, None]
    hh = jax.lax.conv_general_dilated(
        h, w_hh, window_strides=(1, 1),
        padding=[(pad_hh[0], pad_hh[0]), (pad_hh[1], pad_hh[1])],
        dimension_numbers=dn) + b_hh[None, :, None, None]
    z = jax.nn.sigmoid(ih[:, :hc] + hh[:, :hc])
    r = jax.nn.sigmoid(ih[:, hc:2 * hc] + hh[:, hc:2 * hc])
    n = jnp.tanh(ih[:, 2 * hc:] + r * hh[:, 2 * hc:])
    return (1.0 - z) * n + z * h


if __name__ == "__main__":
    B, C_in, H, W = 2, 4, 16, 16
    hidden = 4                       # must equal C_in (see module definition)
    ksize = (3, 3)
    stride = (1, 1)
    padding = (1, 1)
    rksize = (3, 3)

    key = jax.random.PRNGKey(0)
    kx_, kh_, kwih, kwhh, kbih, kbhh = jax.random.split(key, 6)

    x = jax.random.normal(kx_, (B, C_in, H, W), jnp.float32)

    h_out = (H - ksize[0] + 2 * padding[0]) // stride[0] + 1
    w_out = (W - ksize[1] + 2 * padding[1]) // stride[1] + 1
    hx = 0.5 * jax.random.normal(kh_, (B, hidden, h_out, w_out), jnp.float32)

    # Deterministic parameter init (shapes match the PyTorch module).
    fan_in = C_in * ksize[0] * ksize[1]
    fan_out = 3 * hidden * ksize[0] * ksize[1]
    bound = (6.0 / (fan_in + fan_out)) ** 0.5
    w_ih = jax.random.uniform(kwih, (3 * hidden, C_in, ksize[0], ksize[1]),
                              jnp.float32, -bound, bound)          # xavier-uniform
    w_hh = 0.1 * jax.random.normal(kwhh, (3 * hidden, C_in, rksize[0], rksize[1]),
                                   jnp.float32)                    # orthogonal stand-in
    b_ih = 0.05 * jax.random.normal(kbih, (3 * hidden,), jnp.float32)
    b_hh = 0.05 * jax.random.normal(kbhh, (3 * hidden,), jnp.float32)

    out = convgru2d_cell(x, w_ih, w_hh, b_ih, b_hh,
                         kernel_size=ksize, stride=stride, padding=padding,
                         recurrent_kernel_size=rksize, hx_nchw=hx)
    out = jax.block_until_ready(out)

    ref = _reference_convgru(x, hx, w_ih, w_hh, b_ih, b_hh, stride, padding,
                             (rksize[0] // 2, rksize[1] // 2), hidden)
    assert out.shape == (B, hidden, h_out, w_out)
    # bf16 matmul operands with f32 accumulation -> looser tolerance than pure f32.
    err = float(jnp.max(jnp.abs(out - ref)))
    assert jnp.allclose(out, ref, atol=5e-2, rtol=5e-2), err

    print("KERNEL_OK")
</pallas_src>

<mosaic_0001>
module attributes {stable_mosaic.version = 11 : i64} {
  func.func @_convgru_kernel(%arg0: i32, %arg1: memref<1x4x342xbf16, #tpu.memory_space<vmem>>, %arg2: memref<1x4x342xbf16, #tpu.memory_space<vmem>>, %arg3: memref<12x36xbf16, #tpu.memory_space<vmem>>, %arg4: memref<12x36xbf16, #tpu.memory_space<vmem>>, %arg5: memref<12x1xf32, #tpu.memory_space<vmem>>, %arg6: memref<12x1xf32, #tpu.memory_space<vmem>>, %arg7: memref<1x4x288xf32, #tpu.memory_space<vmem>>, %arg8: memref<36x288xbf16, #tpu.memory_space<vmem>>, %arg9: memref<36x288xbf16, #tpu.memory_space<vmem>>) attributes {dimension_semantics = [#tpu.dimension_semantics<parallel>], iteration_bounds = array<i64: 2>, scalar_prefetch = 0 : i64, scratch_operands = 2 : i64, tpu.core_type = #tpu.core_type<tc>, window_params = [{transform_indices = @transform_0, window_bounds = array<i64: 1, 4, 342>}, {transform_indices = @transform_1, window_bounds = array<i64: 1, 4, 342>}, {pipeline_mode = #tpu.pipeline_mode<synchronous>, transform_indices = @transform_2, window_bounds = array<i64: 12, 36>}, {pipeline_mode = #tpu.pipeline_mode<synchronous>, transform_indices = @transform_3, window_bounds = array<i64: 12, 36>}, {pipeline_mode = #tpu.pipeline_mode<synchronous>, transform_indices = @transform_4, window_bounds = array<i64: 12, 1>}, {pipeline_mode = #tpu.pipeline_mode<synchronous>, transform_indices = @transform_5, window_bounds = array<i64: 12, 1>}, {transform_indices = @transform_6, window_bounds = array<i64: 1, 4, 288>}]} {
    %c0 = arith.constant 0 : index
    %c0_0 = arith.constant 0 : index
    %c0_1 = arith.constant 0 : index
    %0 = vector.load %arg1[%c0, %c0_0, %c0_1] : memref<1x4x342xbf16, #tpu.memory_space<vmem>>, vector<1x4x342xbf16>
    %1 = vector.shape_cast %0 : vector<1x4x342xbf16> to vector<4x342xbf16>
    %c0_2 = arith.constant 0 : index
    %c0_3 = arith.constant 0 : index
    %c0_4 = arith.constant 0 : index
    %2 = vector.load %arg2[%c0_2, %c0_3, %c0_4] : memref<1x4x342xbf16, #tpu.memory_space<vmem>>, vector<1x4x342xbf16>
    %3 = vector.shape_cast %2 : vector<1x4x342xbf16> to vector<4x342xbf16>
    %4 = vector.extract_strided_slice %1 {offsets = [0, 0], sizes = [4, 288], strides = [1, 1]} : vector<4x342xbf16> to vector<4x288xbf16>
    %c0_5 = arith.constant 0 : index
    %c0_6 = arith.constant 0 : index
    %5 = vector.load %arg8[%c0_5, %c0_6] : memref<36x288xbf16, #tpu.memory_space<vmem>>, vector<4x288xbf16>
    tpu.vector_store %arg8[%c0_5, %c0_6], %4 {strides = array<i32>} : memref<36x288xbf16, #tpu.memory_space<vmem>>, vector<4x288xbf16>,
    %6 = vector.extract_strided_slice %1 {offsets = [0, 1], sizes = [4, 288], strides = [1, 1]} : vector<4x342xbf16> to vector<4x288xbf16>
    %c4 = arith.constant 4 : index
    %c0_7 = arith.constant 0 : index
    %7 = vector.load %arg8[%c4, %c0_7] : memref<36x288xbf16, #tpu.memory_space<vmem>>, vector<4x288xbf16>
    tpu.vector_store %arg8[%c4, %c0_7], %6 {strides = array<i32>} : memref<36x288xbf16, #tpu.memory_space<vmem>>, vector<4x288xbf16>,
    %8 = vector.extract_strided_slice %1 {offsets = [0, 2], sizes = [4, 288], strides = [1, 1]} : vector<4x342xbf16> to vector<4x288xbf16>
    %c8 = arith.constant 8 : index
    %c0_8 = arith.constant 0 : index
    %9 = vector.load %arg8[%c8, %c0_8] : memref<36x288xbf16, #tpu.memory_space<vmem>>, vector<4x288xbf16>
    tpu.vector_store %arg8[%c8, %c0_8], %8 {strides = array<i32>} : memref<36x288xbf16, #tpu.memory_space<vmem>>, vector<4x288xbf16>,
    %10 = vector.extract_strided_slice %1 {offsets = [0, 18], sizes = [4, 288], strides = [1, 1]} : vector<4x342xbf16> to vector<4x288xbf16>
    %c12 = arith.constant 12 : index
    %c0_9 = arith.constant 0 : index
    %11 = vector.load %arg8[%c12, %c0_9] : memref<36x288xbf16, #tpu.memory_space<vmem>>, vector<4x288xbf16>
    tpu.vector_store %arg8[%c12, %c0_9], %10 {strides = array<i32>} : memref<36x288xbf16, #tpu.memory_space<vmem>>, vector<4x288xbf16>,
    %12 = vector.extract_strided_slice %1 {offsets = [0, 19], sizes = [4, 288], strides = [1, 1]} : vector<4x342xbf16> to vector<4x288xbf16>
    %c16 = arith.constant 16 : index
    %c0_10 = arith.constant 0 : index
    %13 = vector.load %arg8[%c16, %c0_10] : memref<36x288xbf16, #tpu.memory_space<vmem>>, vector<4x288xbf16>
    tpu.vector_store %arg8[%c16, %c0_10], %12 {strides = array<i32>} : memref<36x288xbf16, #tpu.memory_space<vmem>>, vector<4x288xbf16>,
    %14 = vector.extract_strided_slice %1 {offsets = [0, 20], sizes = [4, 288], strides = [1, 1]} : vector<4x342xbf16> to vector<4x288xbf16>
    %c20 = arith.constant 20 : index
    %c0_11 = arith.constant 0 : index
    %15 = vector.load %arg8[%c20, %c0_11] : memref<36x288xbf16, #tpu.memory_space<vmem>>, vector<4x288xbf16>
    tpu.vector_store %arg8[%c20, %c0_11], %14 {strides = array<i32>} : memref<36x288xbf16, #tpu.memory_space<vmem>>, vector<4x288xbf16>,
    %16 = vector.extract_strided_slice %1 {offsets = [0, 36], sizes = [4, 288], strides = [1, 1]} : vector<4x342xbf16> to vector<4x288xbf16>
    %c24 = arith.constant 24 : index
    %c0_12 = arith.constant 0 : index
    %17 = vector.load %arg8[%c24, %c0_12] : memref<36x288xbf16, #tpu.memory_space<vmem>>, vector<4x288xbf16>
    tpu.vector_store %arg8[%c24, %c0_12], %16 {strides = array<i32>} : memref<36x288xbf16, #tpu.memory_space<vmem>>, vector<4x288xbf16>,
    %18 = vector.extract_strided_slice %1 {offsets = [0, 37], sizes = [4, 288], strides = [1, 1]} : vector<4x342xbf16> to vector<4x288xbf16>
    %c28 = arith.constant 28 : index
    %c0_13 = arith.constant 0 : index
    %19 = vector.load %arg8[%c28, %c0_13] : memref<36x288xbf16, #tpu.memory_space<vmem>>, vector<4x288xbf16>
    tpu.vector_store %arg8[%c28, %c0_13], %18 {strides = array<i32>} : memref<36x288xbf16, #tpu.memory_space<vmem>>, vector<4x288xbf16>,
    %20 = vector.extract_strided_slice %1 {offsets = [0, 38], sizes = [4, 288], strides = [1, 1]} : vector<4x342xbf16> to vector<4x288xbf16>
    %c32 = arith.constant 32 : index
    %c0_14 = arith.constant 0 : index
    %21 = vector.load %arg8[%c32, %c0_14] : memref<36x288xbf16, #tpu.memory_space<vmem>>, vector<4x288xbf16>
    tpu.vector_store %arg8[%c32, %c0_14], %20 {strides = array<i32>} : memref<36x288xbf16, #tpu.memory_space<vmem>>, vector<4x288xbf16>,
    %22 = vector.extract_strided_slice %3 {offsets = [0, 0], sizes = [4, 288], strides = [1, 1]} : vector<4x342xbf16> to vector<4x288xbf16>
    %c0_15 = arith.constant 0 : index
    %c0_16 = arith.constant 0 : index
    %23 = vector.load %arg9[%c0_15, %c0_16] : memref<36x288xbf16, #tpu.memory_space<vmem>>, vector<4x288xbf16>
    tpu.vector_store %arg9[%c0_15, %c0_16], %22 {strides = array<i32>} : memref<36x288xbf16, #tpu.memory_space<vmem>>, vector<4x288xbf16>,
    %24 = vector.extract_strided_slice %3 {offsets = [0, 1], sizes = [4, 288], strides = [1, 1]} : vector<4x342xbf16> to vector<4x288xbf16>
    %c4_17 = arith.constant 4 : index
    %c0_18 = arith.constant 0 : index
    %25 = vector.load %arg9[%c4_17, %c0_18] : memref<36x288xbf16, #tpu.memory_space<vmem>>, vector<4x288xbf16>
    tpu.vector_store %arg9[%c4_17, %c0_18], %24 {strides = array<i32>} : memref<36x288xbf16, #tpu.memory_space<vmem>>, vector<4x288xbf16>,
    %26 = vector.extract_strided_slice %3 {offsets = [0, 2], sizes = [4, 288], strides = [1, 1]} : vector<4x342xbf16> to vector<4x288xbf16>
    %c8_19 = arith.constant 8 : index
    %c0_20 = arith.constant 0 : index
    %27 = vector.load %arg9[%c8_19, %c0_20] : memref<36x288xbf16, #tpu.memory_space<vmem>>, vector<4x288xbf16>
    tpu.vector_store %arg9[%c8_19, %c0_20], %26 {strides = array<i32>} : memref<36x288xbf16, #tpu.memory_space<vmem>>, vector<4x288xbf16>,
    %28 = vector.extract_strided_slice %3 {offsets = [0, 18], sizes = [4, 288], strides = [1, 1]} : vector<4x342xbf16> to vector<4x288xbf16>
    %c12_21 = arith.constant 12 : index
    %c0_22 = arith.constant 0 : index
    %29 = vector.load %arg9[%c12_21, %c0_22] : memref<36x288xbf16, #tpu.memory_space<vmem>>, vector<4x288xbf16>
    tpu.vector_store %arg9[%c12_21, %c0_22], %28 {strides = array<i32>} : memref<36x288xbf16, #tpu.memory_space<vmem>>, vector<4x288xbf16>,
    %30 = vector.extract_strided_slice %3 {offsets = [0, 19], sizes = [4, 288], strides = [1, 1]} : vector<4x342xbf16> to vector<4x288xbf16>
    %c16_23 = arith.constant 16 : index
    %c0_24 = arith.constant 0 : index
    %31 = vector.load %arg9[%c16_23, %c0_24] : memref<36x288xbf16, #tpu.memory_space<vmem>>, vector<4x288xbf16>
    tpu.vector_store %arg9[%c16_23, %c0_24], %30 {strides = array<i32>} : memref<36x288xbf16, #tpu.memory_space<vmem>>, vector<4x288xbf16>,
    %32 = vector.extract_strided_slice %3 {offsets = [0, 20], sizes = [4, 288], strides = [1, 1]} : vector<4x342xbf16> to vector<4x288xbf16>
    %c20_25 = arith.constant 20 : index
    %c0_26 = arith.constant 0 : index
    %33 = vector.load %arg9[%c20_25, %c0_26] : memref<36x288xbf16, #tpu.memory_space<vmem>>, vector<4x288xbf16>
    tpu.vector_store %arg9[%c20_25, %c0_26], %32 {strides = array<i32>} : memref<36x288xbf16, #tpu.memory_space<vmem>>, vector<4x288xbf16>,
    %34 = vector.extract_strided_slice %3 {offsets = [0, 36], sizes = [4, 288], strides = [1, 1]} : vector<4x342xbf16> to vector<4x288xbf16>
    %c24_27 = arith.constant 24 : index
    %c0_28 = arith.constant 0 : index
    %35 = vector.load %arg9[%c24_27, %c0_28] : memref<36x288xbf16, #tpu.memory_space<vmem>>, vector<4x288xbf16>
    tpu.vector_store %arg9[%c24_27, %c0_28], %34 {strides = array<i32>} : memref<36x288xbf16, #tpu.memory_space<vmem>>, vector<4x288xbf16>,
    %36 = vector.extract_strided_slice %3 {offsets = [0, 37], sizes = [4, 288], strides = [1, 1]} : vector<4x342xbf16> to vector<4x288xbf16>
    %c28_29 = arith.constant 28 : index
    %c0_30 = arith.constant 0 : index
    %37 = vector.load %arg9[%c28_29, %c0_30] : memref<36x288xbf16, #tpu.memory_space<vmem>>, vector<4x288xbf16>
    tpu.vector_store %arg9[%c28_29, %c0_30], %36 {strides = array<i32>} : memref<36x288xbf16, #tpu.memory_space<vmem>>, vector<4x288xbf16>,
    %38 = vector.extract_strided_slice %3 {offsets = [0, 38], sizes = [4, 288], strides = [1, 1]} : vector<4x342xbf16> to vector<4x288xbf16>
    %c32_31 = arith.constant 32 : index
    %c0_32 = arith.constant 0 : index
    %39 = vector.load %arg9[%c32_31, %c0_32] : memref<36x288xbf16, #tpu.memory_space<vmem>>, vector<4x288xbf16>
    tpu.vector_store %arg9[%c32_31, %c0_32], %38 {strides = array<i32>} : memref<36x288xbf16, #tpu.memory_space<vmem>>, vector<4x288xbf16>,
    %c0_33 = arith.constant 0 : index
    %c0_34 = arith.constant 0 : index
    %40 = vector.load %arg3[%c0_33, %c0_34] : memref<12x36xbf16, #tpu.memory_space<vmem>>, vector<12x36xbf16>
    %c0_35 = arith.constant 0 : index
    %c0_36 = arith.constant 0 : index
    %41 = vector.load %arg8[%c0_35, %c0_36] : memref<36x288xbf16, #tpu.memory_space<vmem>>, vector<36x288xbf16>
    %cst = arith.constant dense<0.000000e+00> : vector<12x288xf32>
    %42 = tpu.matmul %40, %41, %cst {dimension_numbers = #tpu.dot_dimension_numbers<[1], [0], [0], [1], [0, 0, 1, 1], [], []>} : vector<12x36xbf16>, vector<36x288xbf16>, vector<12x288xf32> -> vector<12x288xf32>
    %c0_37 = arith.constant 0 : index
    %c0_38 = arith.constant 0 : index
    %43 = vector.load %arg5[%c0_37, %c0_38] : memref<12x1xf32, #tpu.memory_space<vmem>>, vector<12x1xf32>
    %44 = vector.broadcast %43 : vector<12x1xf32> to vector<12x288xf32>
    %45 = arith.addf %42, %44 : vector<12x288xf32>
    %c0_39 = arith.constant 0 : index
    %c0_40 = arith.constant 0 : index
    %46 = vector.load %arg4[%c0_39, %c0_40] : memref<12x36xbf16, #tpu.memory_space<vmem>>, vector<12x36xbf16>
    %c0_41 = arith.constant 0 : index
    %c0_42 = arith.constant 0 : index
    %47 = vector.load %arg9[%c0_41, %c0_42] : memref<36x288xbf16, #tpu.memory_space<vmem>>, vector<36x288xbf16>
    %cst_43 = arith.constant dense<0.000000e+00> : vector<12x288xf32>
    %48 = tpu.matmul %46, %47, %cst_43 {dimension_numbers = #tpu.dot_dimension_numbers<[1], [0], [0], [1], [0, 0, 1, 1], [], []>} : vector<12x36xbf16>, vector<36x288xbf16>, vector<12x288xf32> -> vector<12x288xf32>
    %c0_44 = arith.constant 0 : index
    %c0_45 = arith.constant 0 : index
    %49 = vector.load %arg6[%c0_44, %c0_45] : memref<12x1xf32, #tpu.memory_space<vmem>>, vector<12x1xf32>
    %50 = vector.broadcast %49 : vector<12x1xf32> to vector<12x288xf32>
    %51 = arith.addf %48, %50 : vector<12x288xf32>
    %52 = vector.extract_strided_slice %45 {offsets = [0, 0], sizes = [4, 288], strides = [1, 1]} : vector<12x288xf32> to vector<4x288xf32>
    %53 = vector.extract_strided_slice %51 {offsets = [0, 0], sizes = [4, 288], strides = [1, 1]} : vector<12x288xf32> to vector<4x288xf32>
    %54 = arith.addf %52, %53 : vector<4x288xf32>
    %55 = arith.negf %54 : vector<4x288xf32>
    %56 = math.exp %55 : vector<4x288xf32>
    %cst_46 = arith.constant 1.000000e+00 : f32
    %57 = vector.broadcast %cst_46 : f32 to vector<4x288xf32>
    %58 = arith.addf %57, %56 : vector<4x288xf32>
    %59 = arith.divf %57, %58 : vector<4x288xf32>
    %60 = vector.extract_strided_slice %45 {offsets = [4, 0], sizes = [4, 288], strides = [1, 1]} : vector<12x288xf32> to vector<4x288xf32>
    %61 = vector.extract_strided_slice %51 {offsets = [4, 0], sizes = [4, 288], strides = [1, 1]} : vector<12x288xf32> to vector<4x288xf32>
    %62 = arith.addf %60, %61 : vector<4x288xf32>
    %63 = arith.negf %62 : vector<4x288xf32>
    %64 = math.exp %63 : vector<4x288xf32>
    %cst_47 = arith.constant 1.000000e+00 : f32
    %65 = vector.broadcast %cst_47 : f32 to vector<4x288xf32>
    %66 = arith.addf %65, %64 : vector<4x288xf32>
    %67 = arith.divf %65, %66 : vector<4x288xf32>
    %68 = vector.extract_strided_slice %45 {offsets = [8, 0], sizes = [4, 288], strides = [1, 1]} : vector<12x288xf32> to vector<4x288xf32>
    %69 = vector.extract_strided_slice %51 {offsets = [8, 0], sizes = [4, 288], strides = [1, 1]} : vector<12x288xf32> to vector<4x288xf32>
    %70 = arith.mulf %67, %69 : vector<4x288xf32>
    %71 = arith.addf %68, %70 : vector<4x288xf32>
    %72 = math.tanh %71 : vector<4x288xf32>
    %c16_48 = arith.constant 16 : index
    %c0_49 = arith.constant 0 : index
    %73 = vector.load %arg9[%c16_48, %c0_49] : memref<36x288xbf16, #tpu.memory_space<vmem>>, vector<4x288xbf16>
    %74 = arith.extf %73 : vector<4x288xbf16> to vector<4x288xf32>
    %cst_50 = arith.constant 1.000000e+00 : f32
    %75 = vector.broadcast %cst_50 : f32 to vector<4x288xf32>
    %76 = arith.subf %75, %59 : vector<4x288xf32>
    %77 = arith.mulf %76, %72 : vector<4x288xf32>
    %78 = arith.mulf %59, %74 : vector<4x288xf32>
    %79 = arith.addf %77, %78 : vector<4x288xf32>
    %c0_51 = arith.constant 0 : index
    %c0_52 = arith.constant 0 : index
    %c0_53 = arith.constant 0 : index
    %80 = vector.load %arg7[%c0_51, %c0_52, %c0_53] : memref<1x4x288xf32, #tpu.memory_space<vmem>>, vector<1x4x288xf32>
    %81 = vector.shape_cast %80 : vector<1x4x288xf32> to vector<4x288xf32>
    %82 = vector.shape_cast %79 : vector<4x288xf32> to vector<1x4x288xf32>
    tpu.vector_store %arg7[%c0_51, %c0_52, %c0_53], %82 {strides = array<i32>} : memref<1x4x288xf32, #tpu.memory_space<vmem>>, vector<1x4x288xf32>,
    return
  }
  func.func @transform_0(%arg0: i32) -> (i32, i32, i32) {
    %c0_i32 = arith.constant 0 : i32
    %c0_i32_0 = arith.constant 0 : i32
    %c0_i32_1 = arith.constant 0 : i32
    return %arg0, %c0_i32, %c0_i32_0 : i32, i32, i32
  }
  func.func @transform_1(%arg0: i32) -> (i32, i32, i32) {
    %c0_i32 = arith.constant 0 : i32
    %c0_i32_0 = arith.constant 0 : i32
    %c0_i32_1 = arith.constant 0 : i32
    return %arg0, %c0_i32, %c0_i32_0 : i32, i32, i32
  }
  func.func @transform_2(%arg0: i32) -> (i32, i32) {
    %c0_i32 = arith.constant 0 : i32
    %c0_i32_0 = arith.constant 0 : i32
    %c0_i32_1 = arith.constant 0 : i32
    return %c0_i32, %c0_i32_0 : i32, i32
  }
  func.func @transform_3(%arg0: i32) -> (i32, i32) {
    %c0_i32 = arith.constant 0 : i32
    %c0_i32_0 = arith.constant 0 : i32
    %c0_i32_1 = arith.constant 0 : i32
    return %c0_i32, %c0_i32_0 : i32, i32
  }
  func.func @transform_4(%arg0: i32) -> (i32, i32) {
    %c0_i32 = arith.constant 0 : i32
    %c0_i32_0 = arith.constant 0 : i32
    %c0_i32_1 = arith.constant 0 : i32
    return %c0_i32, %c0_i32_0 : i32, i32
  }
  func.func @transform_5(%arg0: i32) -> (i32, i32) {
    %c0_i32 = arith.constant 0 : i32
    %c0_i32_0 = arith.constant 0 : i32
    %c0_i32_1 = arith.constant 0 : i32
    return %c0_i32, %c0_i32_0 : i32, i32
  }
  func.func @transform_6(%arg0: i32) -> (i32, i32, i32) {
    %c0_i32 = arith.constant 0 : i32
    %c0_i32_0 = arith.constant 0 : i32
    %c0_i32_1 = arith.constant 0 : i32
    return %arg0, %c0_i32, %c0_i32_0 : i32, i32, i32
  }
}

</mosaic_0001>

<bundles_post_ra>
// kernel: tpu_custom_call.1
= control target key start
LH: loop header
LB: loop body
LE: loop exit
PB: predicated region body
PF: predicated region fallthrough
CT: control target
= control target key end

     0   :  { %11 = vsyncpa [#allocation5], 0  ;;  %s1587_s0 = inlined_call_operand.vmem [shape: bf16[2,4,342], index: 0, kind: input, shape index: {}]   ;;  %s1588_s1 = inlined_call_operand.vmem [shape: bf16[2,4,342], index: 1, kind: input, shape index: {}]   ;;  %s1589_s2 = inlined_call_operand.vmem [shape: bf16[12,36], index: 2, kind: input, shape index: {}]   ;;  %s1590_s3 = inlined_call_operand.hbm [shape: bf16[12,36], index: 3, kind: input, shape index: {}]   ;;  %s1591_s4 = inlined_call_operand.vmem [shape: f32[12,1], index: 4, kind: input, shape index: {}]   ;;  %s1592_s5 = inlined_call_operand.vmem [shape: f32[12,1], index: 5, kind: input, shape index: {}]   ;;  %s1593_s6 = inlined_call_operand.hbm [shape: f32[2,4,288], index: 6, kind: output, shape index: {}]  }
   0x1   :  { %12 = vsyncpa [#allocation6], 0 }
   0x2   :  { %14 = vsyncpa [#allocation6 + $0x1], 0  ;;  %s1370_s21 = smov 0   ;;  %s1372_s22 = smov 0  }
   0x3   :  { %s1374_s23 = smov 0   ;;  %s1376_s24 = smov 0  }
   0x4 LB: > { %s1391_s25 = sadd.s32 4294967295, %s1317_s24   ;;  %s1049_s26 = sadd.s32 4294967294, %s1317_s24   ;;  %s1317_s24 = sphi %s1376_s24, %s1601_s24   ;;  %s1313_s23 = sphi %s1374_s23, %s1600_s23   ;;  %s1309_s22 = sphi %s1372_s22, %s1599_s22   ;;  %s1305_s21 = sphi %s1370_s21, %s1598_s21  }
   0x5   : > { %s1395_s27 = sadd.s32 1, %s1317_s24   ;;  %s163_s28 = sadd.s32 1, %s1313_s23 }
   0x6   : > { %s160_s29 = ssub.s32 %s1317_s24, %s1395_s27  ;;  %p173_p0 = scmp.ne.s32.totalorder %s1313_s23, %s1309_s22 }
   0x7   : > { %p161_p1 = scmp.eq.s32.totalorder %s160_s29, 0  ;;  %p174_p2 = scmp.eq.s32.totalorder %s1391_s25, 1 }
   0x8   : > { %p179_p3 = scmp.ne.s32.totalorder %s1309_s22, %s1305_s21  ;;  %p180_p4 = scmp.eq.s32.totalorder %s1049_s26, 1 }
   0x9   : > { %s1406_s30 = scalar_select %p161_p1, %s1313_s23, %s163_s28  }
   0xa   : > { %p1408_p5 = por %p174_p2, %p173_p0  ;;  %p1412_p6 = por %p180_p4, %p179_p3 }
   0xb   : > { %p1050_p7 = scmp.ge.s32.totalorder %s1317_s24, 1  ;;  %p187_p8 = scmp.lt.s32.totalorder %s1317_s24, 3 }
   0xc   : > { %s1595_s8 = scalar_select %p1412_p6, 1, 0 }
   0xd   : > { %p1136_p9 = scmp.eq.s32.totalorder %s1391_s25, 0  ;;  %p1419_p10 = pnand %p1050_p7, %p187_p8 }
   0xe   : > { %s1319_s10 = smov [#allocation4]  }
   0xf   : > { %s202_s11 = sshll.u32 %s1319_s10, 4  ;;  %p1128_p11 = pneg %p1419_p10  ;;  %s203_s11 = int_to_ptr.vmem [resolvable:$true] %s202_s11 }
  0x10   : > { %s1238_s12 = scalar_lea.vmem %s203_s11, 128  ;;  %p1246_p3 = scmp.lt.s32.totalorder %s203_s11, %s203_s11 }
  0x11   : > { %p1129_p12 = pnand %p1136_p9, %p1128_p11  ;;  %p1239_p0 = scmp.ne.s32.totalorder %s203_s11, %s1238_s12 }
  0x12   : > { %p1247_p4 = scmp.lt.s32.totalorder %s1238_s12, %s1238_s12 }
  0x13   : > { %p1229_p13 = pneg %p1129_p12 }
  0x14   : > { %p1248_p6 = por %p1247_p4, %p1246_p3 }
  0x15   : > { %p1241_p1 = pnand %p1239_p0, %p1229_p13 }
  0x17   : > { %p1242_p2 = pneg %p1241_p1 }
  0x19   : > { %p1249_p7 = pnand %p1248_p6, %p1242_p2 }
  0x1b   : > { %1252 = shalt.err (!%p1249_p7)
}
  0x1c   : > { %s1320_s13 = smov 64   ;;  %s1321_s14 = smov 4  }
  0x1d   : > { %1131 = dma.hbm_to_vmem [thread:$0]  (!%p1129_p12), %s1590_s3, 128, %s203_s11, [#allocation5], %s1320_s13, %s1320_s13, %s1321_s14  }
  0x1e   : > { %240 = sbr.rel (%p1419_p10) target bundleno = 507 (0x1fb), region = 44 }
  0x23   : > { %1296 = dma.done.wait (%p1136_p9), [#allocation5], 128  }
  0x24   : > { %1298 = vsyncadd (%p1136_p9), [#allocation5], 4294967168  ;;  %p275_p8 = scmp.lt.s32.totalorder %s1391_s25, 1  ;;  %v293_v0 = vlaneseq  ;;  %v1322_v1 = vmov 1983009808   ;;  %s1323_s10 = smov 109  }
  0x25   : > { %v291_v2 = vunpack.c.l.s4 %v1322_v1  ;;  %s1324_s11 = smov 90   ;;  %vm307_vm0 = vcmask 254976   ;;  %s1325_s12 = smov 108   ;;  %v1327_v14 = vmov 0.0   ;;  %vm1332_vm1 = vmmov 0   ;;  %v559_v20 = vld [vmem:[%s1591_s4] sm:$0xff] }
  0x26   : > { %s276_s17 = scalar_select %p275_p8, %s1391_s25, 1  ;;  %v294_v3 = vshrl.u32 %v293_v0, 7  ;;  %1099 = vmatprep.subr.bf16.mxu1 %v1327_v14  ;;  %1105 = vmatprep.mubr.msk.bf16.mxu1 %vm1332_vm1, %v1327_v14  ;;  %v1333_v18 = vmov 0   ;;  %v726_v21 = vld [vmem:[%s1592_s5] sm:$0xff]  ;;  %v560_v22 = vld [vmem:[%s1591_s4 + $0x8] sm:$0xf] }
  0x27   : > { %v292_v4 = vunpack.c.0.s8 %v291_v2  ;;  %s1326_s13 = smov 92   ;;  %s1328_s14 = smov 91   ;;  %662 = vmatprep.mubr.bf16.mxu0 %v1333_v18  ;;  %1186 = vset.pattern.permute.xlu0 %v1333_v18  ;;  %v727_v23 = vld [vmem:[%s1592_s5 + $0x8] sm:$0xf]  ;;  %vm330_vm2 = vcmask 257026   ;;  %vm323_vm3 = vcmask 1043456  }
  0x28   : > { %s1120_s18 = smul.u32 6, %s276_s17  ;;  %s1329_s15 = smov 127   ;;  %1187 = vset.pattern.permute.xlu1 %v1333_v18  ;;  %vm365_vm4 = vcmask 891904   ;;  %vm417_vm5 = vcmask 736256   ;;  %vm391_vm6 = vcmask 752640   ;;  %vm378_vm7 = vcmask 883712  }
  0x29   : > { %v295_v5 = vsub.s32 %v292_v4, %v294_v3  ;;  %s1330_s16 = smov 126   ;;  %s1331_s17 = smov 110   ;;  %vm620_vm8 = vcmask 1041408   ;;  %vm404_vm9 = vcmask 744448   ;;  %vm325_vm10 = vcmask 1039360  }
  0x2a   : > { %s279_s26 = scalar_lea.vmem %s1587_s0, %s1120_s18  ;;  %s284_s9 = scalar_lea.vmem %s1588_s1, %s1120_s18  ;;  %vm339_vm11 = vcmask 1031168   ;;  %vm352_vm12 = vcmask 900096   ;;  %vm616_vm13 = vcmask 293888   ;;  %vm949_vm14 = vcmask 257024  }
  0x2b   : > { %v286_v6 = vld [vmem:[%s279_s26] sm:$0x3f]  ;;  %s1334_s29 = smov [#allocation7]  }
  0x2c   : > { %v287_v7 = vld [vmem:[%s284_s9] sm:$0x3f]  ;;  %v296_v8 = vrot.slane %v286_v6, %v295_v5  ;;  %1057 = vst.sshfl [vmem:[#allocation2] sm:$0xf pattern:$0x76325410] %v286_v6  ;;  %v289_v9 = vcombine.high %v286_v6, %v286_v6  ;;  %v309_v13 = vcombine.low %v286_v6, %v286_v6 }
  0x2d   : > { %v424_v10 = vcombine.high %v287_v7, %v287_v7  ;;  %1058 = vst.sshfl [vmem:[#allocation3] sm:$0xf pattern:$0x76325410] %v287_v7  ;;  %v431_v16 = vrot.slane %v287_v7, %v295_v5  ;;  %v443_v17 = vcombine.low %v287_v7, %v287_v7  ;;  %s1257_s9 = sshll.u32 %s1334_s29, 4  ;;  %s1258_s9 = int_to_ptr.vmem [resolvable:$false] %s1257_s9 }
  0x2e   : > { %358 = vrot.lane.b32.xlu1 %v296_v8, %s1323_s10  ;;  %410 = vrot.lane.b32.xlu0 %v296_v8, %s1324_s11  ;;  %v303_v11 = vrot.slane %v289_v9, %v295_v5  ;;  %v316_v15 = vrot.slane %v309_v13, %v295_v5 }
  0x2f   : > { %v438_v12 = vrot.slane %v424_v10, %v295_v5  ;;  %v450_v19 = vrot.slane %v443_v17, %v295_v5 }
  0x30   : > { %308 = vst.msk [vmem:[#allocation2 + $0x8] sm:$0x3] %vm307_vm0, %v303_v11 }
  0x31   : > { %442 = vst.msk [vmem:[#allocation3 + $0x8] sm:$0x3] %vm307_vm0, %v438_v12 }
  0x32   : > { %373 = vrot.lane.b32.xlu1 %v296_v8, %s1325_s12  ;;  %384 = vrot.lane.b32.xlu0 %v296_v8, %s1326_s13 }
  0x36   : > { %360 = vrot.lane.b32.xlu1 %v303_v11, %s1323_s10  ;;  %412 = vrot.lane.b32.xlu0 %v303_v11, %s1324_s11 }
  0x3a   : > { %386 = vrot.lane.b32.xlu1 %v303_v11, %s1326_s13  ;;  %371 = vrot.lane.b32.xlu0 %v316_v15, %s1325_s12 }
  0x3e   : > { %399 = vrot.lane.b32.xlu1 %v296_v8, %s1328_s14  ;;  %397 = vrot.lane.b32.xlu0 %v316_v15, %s1328_s14 }
  0x42   : > { %319 = vrot.lane.b32.xlu1 %v296_v8, %s1329_s15  ;;  %317 = vrot.lane.b32.xlu0 %v316_v15, %s1329_s15 }
  0x46   : > { %334 = vrot.lane.b32.xlu1 %v303_v11, %s1330_s16  ;;  %332 = vrot.lane.b32.xlu0 %v296_v8, %s1330_s16 }
  0x4a   : > { %347 = vrot.lane.b32.xlu1 %v296_v8, %s1331_s17  ;;  %345 = vrot.lane.b32.xlu0 %v316_v15, %s1331_s17 }
  0x4e   : > { %537 = vrot.lane.b32.xlu1 %v438_v12, %s1324_s11  ;;  %535 = vrot.lane.b32.xlu0 %v431_v16, %s1324_s11 }
  0x52   : > { %489 = vrot.lane.b32.xlu1 %v438_v12, %s1323_s10  ;;  %487 = vrot.lane.b32.xlu0 %v431_v16, %s1323_s10 }
  0x56   : > { %501 = vrot.lane.b32.xlu1 %v431_v16, %s1325_s12  ;;  %499 = vrot.lane.b32.xlu0 %v450_v19, %s1325_s12 }
  0x5a   : > { %513 = vrot.lane.b32.xlu1 %v438_v12, %s1326_s13  ;;  %511 = vrot.lane.b32.xlu0 %v431_v16, %s1326_s13  ;;  %s272_s13 = sand.u32 1, %s1309_s22  }
  0x5b   : > { %s952_s26 = scalar_lea.sflag [#allocation6], %s272_s13 }
  0x5e   : > { %525 = vrot.lane.b32.xlu1 %v431_v16, %s1328_s14  ;;  %523 = vrot.lane.b32.xlu0 %v450_v19, %s1328_s14  ;;  %s1119_s14 = smul.u32 12, %s272_s13 }
  0x62   : > { %453 = vrot.lane.b32.xlu1 %v431_v16, %s1329_s15  ;;  %451 = vrot.lane.b32.xlu0 %v450_v19, %s1329_s15  ;;  %s274_s15 = scalar_lea.vmem [#allocation7], %s1119_s14 }
  0x66   : > { %465 = vrot.lane.b32.xlu1 %v438_v12, %s1330_s16  ;;  %463 = vrot.lane.b32.xlu0 %v431_v16, %s1330_s16  ;;  %s1121_s16 = smul.u32 192, %s1391_s25  ;;  %s1259_s25 = scalar_lea.vmem %s1258_s9, 384 }
  0x68   : > { %s964_s20 = scalar_lea.hbm %s1593_s6, %s1121_s16 }
  0x6a   : > { %477 = vrot.lane.b32.xlu1 %v431_v16, %s1331_s17  ;;  %475 = vrot.lane.b32.xlu0 %v450_v19, %s1331_s17  ;;  %s966_s17 = sshll.u32 %s274_s15, 4  ;;  %s967_s17 = int_to_ptr.vmem [resolvable:$true] %s966_s17 }
  0x6b   : > { %s1253_s28 = scalar_lea.vmem %s967_s17, 192  ;;  %p1260_p11 = scmp.lt.s32.totalorder %s967_s17, %s1258_s9 }
  0x6c   : > { %p1254_p6 = scmp.ne.s32.totalorder %s967_s17, %s1253_s28  ;;  %p1261_p12 = scmp.lt.s32.totalorder %s1259_s25, %s1253_s28 }
  0x6e   : > { %563 = vperm.xlu0 %1186, %v559_v20   ;;  %730 = vperm.xlu1 %1187, %v726_v21   ;;  %p1255_p9 = pnand %p1254_p6, %p1408_p5  ;;  %p1262_p13 = por %p1261_p12, %p1260_p11 }
  0x70   : > { %p1256_p10 = pneg %p1255_p9 }
  0x72   : > { %568 = vperm.xlu0 %1186, %v560_v22   ;;  %735 = vperm.xlu1 %1187, %v727_v23   ;;  %p1263_p0 = pnand %p1262_p13, %p1256_p10 }
  0xa0   : > { %v359_v24 = vpop.permute.xlu1 %358  ;;  %v411_v25 = vpop.permute.xlu0 %410 }
  0xa1   : > { %v362_v30 = vrot.slane %v359_v24, 4  ;;  %v414_v31 = vrot.slane %v411_v25, 4 }
  0xa4   : > { %v374_v26 = vpop.permute.xlu1 %373  ;;  %v385_v27 = vpop.permute.xlu0 %384 }
  0xa5   : > { %383 = vst.msk [vmem:[#allocation2 + $0x20] sm:$0xc] %vm330_vm2, %v374_v26  ;;  %v376_v40 = vrot.slane %v374_v26, 4  ;;  %v388_v41 = vrot.slane %v385_v27, 4 }
  0xa8   : > { %v361_v28 = vpop.permute.xlu1 %360  ;;  %v413_v29 = vpop.permute.xlu0 %412 }
  0xa9   : > { %v363_v32 = vrot.slane %v361_v28, 4  ;;  %370 = vst.msk [vmem:[#allocation2 + $0x20] sm:$0x3] %vm307_vm0, %v361_v28  ;;  %v415_v33 = vrot.slane %v413_v29, 4  ;;  %422 = vst.msk [vmem:[#allocation2 + $0x38] sm:$0x3] %vm307_vm0, %v413_v29 }
  0xab   : > { %v364_v34 = vsel %vm323_vm3, %v362_v30, %v363_v32  ;;  %v416_v35 = vsel %vm323_vm3, %v414_v31, %v415_v33  ;;  %v1197_v32 = vld [vmem:[%s1589_s2] sm:$0x3f]  }
  0xac   : > { %v366_v36 = vsel %vm365_vm4, %v359_v24, %v364_v34  ;;  %v418_v37 = vsel %vm417_vm5, %v411_v25, %v416_v35  ;;  %v387_v38 = vpop.permute.xlu1 %386  ;;  %v372_v39 = vpop.permute.xlu0 %371 }
  0xad   : > { %369 = vst [vmem:[#allocation2 + $0x18] sm:$0x33] %v366_v36  ;;  %421 = vst [vmem:[#allocation2 + $0x30] sm:$0x33] %v418_v37  ;;  %v389_v42 = vrot.slane %v387_v38, 4  ;;  %v375_v43 = vrot.slane %v372_v39, 4 }
  0xae   : > { %396 = vst.msk [vmem:[#allocation2 + $0x2c] sm:$0x3] %vm307_vm0, %v387_v38 }
  0xaf   : > { %v390_v44 = vsel %vm323_vm3, %v388_v41, %v389_v42  ;;  %v377_v45 = vsel %vm323_vm3, %v375_v43, %v376_v40 }
  0xb0   : > { %v392_v46 = vsel %vm391_vm6, %v385_v27, %v390_v44  ;;  %v379_v47 = vsel %vm378_vm7, %v372_v39, %v377_v45  ;;  %v400_v48 = vpop.permute.xlu1 %399  ;;  %v398_v49 = vpop.permute.xlu0 %397  ;;  %v1189_v50 = vld [vmem:[#allocation2 + $0x38] ss:$0 sps:$4 sm:$0x33]  }
  0xb1   : > { %395 = vst [vmem:[#allocation2 + $0x24] sm:$0x33] %v392_v46  ;;  %382 = vst [vmem:[#allocation2 + $0x18] sm:$0xcc] %v379_v47  ;;  %v402_v51 = vrot.slane %v400_v48, 4  ;;  %v401_v52 = vrot.slane %v398_v49, 4 }
  0xb2   : > { %409 = vst.msk [vmem:[#allocation2 + $0x2c] sm:$0xc] %vm330_vm2, %v400_v48  ;;  %v628_v53 = vsel %vm620_vm8, %v1189_v50, 0 }
  0xb3   : > { %v403_v54 = vsel %vm323_vm3, %v401_v52, %v402_v51  ;;  %1100 = vmatpush3.bf16.msra.mxu1 %v628_v53 }
  0xb4   : > { %v405_v55 = vsel %vm404_vm9, %v398_v49, %v403_v54  ;;  %v320_v56 = vpop.permute.xlu1 %319  ;;  %v318_v57 = vpop.permute.xlu0 %317  ;;  %v557_v58 = vld [vmem:[#allocation2 + $0x30] sm:$0x33]  ;;  %1101 = vmatprep.subr.bf16.mxu1 %v1327_v14 }
  0xb5   : > { %408 = vst [vmem:[#allocation2 + $0x24] sm:$0xcc] %v405_v55  ;;  %v322_v59 = vrot.slane %v320_v56, 4  ;;  %331 = vst.msk [vmem:[#allocation2 + $0x8] sm:$0xc] %vm330_vm2, %v320_v56  ;;  %v321_v60 = vrot.slane %v318_v57, 4  ;;  %v1067_v61 = vcombine.high %v557_v58, %v557_v58  ;;  %v1066_v62 = vcombine.low %v557_v58, %v557_v58 }
  0xb7   : > { %v324_v63 = vsel %vm323_vm3, %v321_v60, %v322_v59  ;;  %1069 = vmatprep.subr.msk.bf16.mxu0 %vm620_vm8, %v1067_v61  ;;  %v622_v0 = vsel %vm620_vm8, %v1066_v62, 0 }
  0xb8   : > { %v326_v1 = vsel %vm325_vm10, %v318_v57, %v324_v63  ;;  %v335_v2 = vpop.permute.xlu1 %334  ;;  %641 = vmatpush1.bf16.msra.mxu0 %v622_v0  ;;  %v333_v3 = vpop.permute.xlu0 %332  ;;  %v553_v8 = vld [vmem:[#allocation2 + $0x18] sm:$0xff] }
  0xb9   : > { %v1191_v4 = vld [vmem:[#allocation2 + $0x20] ss:$12 sps:$4 sm:$0xff]   ;;  %329 = vst [vmem:[#allocation2] sm:$0xcc] %v326_v1  ;;  %v337_v5 = vrot.slane %v335_v2, 4  ;;  %v336_v6 = vrot.slane %v333_v3, 4 }
  0xba   : > { %344 = vst.msk [vmem:[#allocation2 + $0x14] sm:$0x3] %vm307_vm0, %v335_v2  ;;  %1102 = vmatpush3.bf16.msra.mxu1 %v1191_v4 }
  0xbb   : > { %v338_v7 = vsel %vm323_vm3, %v336_v6, %v337_v5  ;;  %1103 = vmatprep.subr.bf16.mxu1 %v1327_v14 }
  0xbc   : > { %v340_v9 = vsel %vm339_vm11, %v333_v3, %v338_v7  ;;  %v348_v10 = vpop.permute.xlu1 %347  ;;  %v346_v11 = vpop.permute.xlu0 %345  ;;  %v555_v12 = vld [vmem:[#allocation2 + $0x24] sm:$0xff] }
  0xbd   : > { %v1192_v13 = vld [vmem:[#allocation2 + $0x1c] ss:$12 sps:$4 sm:$0xff]   ;;  %343 = vst [vmem:[#allocation2 + $0xc] sm:$0x33] %v340_v9  ;;  %v350_v15 = vrot.slane %v348_v10, 4  ;;  %v349_v16 = vrot.slane %v346_v11, 4  ;;  %v1063_v17 = vcombine.low %v553_v8, %v555_v12 }
  0xbe   : > { %357 = vst.msk [vmem:[#allocation2 + $0x14] sm:$0xc] %vm330_vm2, %v348_v10  ;;  %642 = vmatprep.subr.bf16.mxu0 %v1192_v13 }
  0xbf   : > { %v351_v19 = vsel %vm323_vm3, %v349_v16, %v350_v15  ;;  %643 = vmatpush1.bf16.msra.mxu0 %v1063_v17 }
  0xc0   : > { %v353_v20 = vsel %vm352_vm12, %v346_v11, %v351_v19  ;;  %v538_v21 = vpop.permute.xlu1 %537  ;;  %v536_v22 = vpop.permute.xlu0 %535  ;;  %v549_v34 = vld [vmem:[#allocation2] sm:$0xff] }
  0xc1   : > { %356 = vst [vmem:[#allocation2 + $0xc] sm:$0xcc] %v353_v20  ;;  %v540_v23 = vrot.slane %v538_v21, 4  ;;  %546 = vst.msk [vmem:[#allocation3 + $0x38] sm:$0x3] %vm307_vm0, %v538_v21  ;;  %v539_v24 = vrot.slane %v536_v22, 4 }
  0xc3   : > { %v541_v25 = vsel %vm323_vm3, %v539_v24, %v540_v23 }
  0xc4   : > { %v542_v26 = vsel %vm417_vm5, %v536_v22, %v541_v25  ;;  %v490_v27 = vpop.permute.xlu1 %489  ;;  %v488_v28 = vpop.permute.xlu0 %487 }
  0xc5   : > { %v1194_v29 = vld [vmem:[#allocation2 + $0x8] ss:$12 sps:$4 sm:$0xff]   ;;  %545 = vst [vmem:[#allocation3 + $0x30] sm:$0x33] %v542_v26  ;;  %v492_v30 = vrot.slane %v490_v27, 4  ;;  %v491_v31 = vrot.slane %v488_v28, 4 }
  0xc6   : > { %498 = vst.msk [vmem:[#allocation3 + $0x20] sm:$0x3] %vm307_vm0, %v490_v27  ;;  %1104 = vmatpush3.bf16.msra.mxu1 %v1194_v29 }
  0xc7   : > { %v493_v33 = vsel %vm323_vm3, %v491_v31, %v492_v30  ;;  %1109 = vmatprep.subr.bf16.mxu1 %v1327_v14 }
  0xc8   : > { %v494_v35 = vsel %vm365_vm4, %v488_v28, %v493_v33  ;;  %v502_v36 = vpop.permute.xlu1 %501  ;;  %v500_v37 = vpop.permute.xlu0 %499  ;;  %v551_v38 = vld [vmem:[#allocation2 + $0xc] sm:$0xff]  ;;  %v1198_v43 = vld [vmem:[#allocation3 + $0x38] ss:$0 sps:$4 sm:$0x33]  }
  0xc9   : > { %v1195_v39 = vld [vmem:[#allocation2 + $0x4] ss:$12 sps:$4 sm:$0xff]   ;;  %497 = vst [vmem:[#allocation3 + $0x18] sm:$0x33] %v494_v35  ;;  %v504_v40 = vrot.slane %v502_v36, 4  ;;  %v503_v41 = vrot.slane %v500_v37, 4  ;;  %v1060_v42 = vcombine.low %v549_v34, %v551_v38  ;;  %1106 = vmatmul.mubr.msk.bf16.vlgmr.msra.gmra.mxu1 %vm616_vm13, %v1197_v32 }
  0xca   : > { %510 = vst.msk [vmem:[#allocation3 + $0x20] sm:$0xc] %vm330_vm2, %v502_v36  ;;  %644 = vmatprep.subr.bf16.mxu0 %v1195_v39  ;;  %1115 = vmatprep.mubr.msk.bf16.mxu1 %vm1332_vm1, %v1327_v14  ;;  %v793_v45 = vsel %vm620_vm8, %v1198_v43, 0 }
  0xcb   : > { %v505_v44 = vsel %vm323_vm3, %v503_v41, %v504_v40  ;;  %645 = vmatpush1.bf16.msra.mxu0 %v1060_v42  ;;  %1110 = vmatpush3.bf16.msra.mxu1 %v793_v45 }
  0xcc   : > { %v506_v46 = vsel %vm378_vm7, %v500_v37, %v505_v44  ;;  %v514_v47 = vpop.permute.xlu1 %513  ;;  %v512_v48 = vpop.permute.xlu0 %511  ;;  %v724_v49 = vld [vmem:[#allocation3 + $0x30] sm:$0x33]  ;;  %1111 = vmatprep.subr.bf16.mxu1 %v1327_v14 }
  0xcd   : > { %509 = vst [vmem:[#allocation3 + $0x18] sm:$0xcc] %v506_v46  ;;  %v516_v50 = vrot.slane %v514_v47, 4  ;;  %522 = vst.msk [vmem:[#allocation3 + $0x2c] sm:$0x3] %vm307_vm0, %v514_v47  ;;  %v515_v51 = vrot.slane %v512_v48, 4  ;;  %v1080_v52 = vcombine.high %v724_v49, %v724_v49  ;;  %v1079_v53 = vcombine.low %v724_v49, %v724_v49 }
  0xce   : > { %1070 = vmatmul.mubr.msk.bf16.vlgmr.msra.gmra.mxu0 %vm616_vm13, %v1197_v32 }
  0xcf   : > { %v517_v54 = vsel %vm323_vm3, %v515_v51, %v516_v50  ;;  %1082 = vmatprep.subr.msk.bf16.mxu0 %vm620_vm8, %v1080_v52  ;;  %v787_v55 = vsel %vm620_vm8, %v1079_v53, 0  ;;  %827 = vmatprep.mubr.bf16.mxu0 %v1333_v18 }
  0xd0   : > { %v518_v56 = vsel %vm391_vm6, %v512_v48, %v517_v54  ;;  %v526_v57 = vpop.permute.xlu1 %525  ;;  %806 = vmatpush1.bf16.msra.mxu0 %v787_v55  ;;  %v524_v58 = vpop.permute.xlu0 %523 }
  0xd1   : > { %521 = vst [vmem:[#allocation3 + $0x24] sm:$0x33] %v518_v56  ;;  %v528_v59 = vrot.slane %v526_v57, 4  ;;  %534 = vst.msk [vmem:[#allocation3 + $0x2c] sm:$0xc] %vm330_vm2, %v526_v57  ;;  %v527_v60 = vrot.slane %v524_v58, 4 }
  0xd3   : > { %v529_v61 = vsel %vm323_vm3, %v527_v60, %v528_v59 }
  0xd4   : > { %v530_v62 = vsel %vm404_vm9, %v524_v58, %v529_v61  ;;  %v454_v63 = vpop.permute.xlu1 %453  ;;  %v452_v0 = vpop.permute.xlu0 %451 }
  0xd5   : > { %533 = vst [vmem:[#allocation3 + $0x24] sm:$0xcc] %v530_v62  ;;  %v456_v1 = vrot.slane %v454_v63, 4  ;;  %462 = vst.msk [vmem:[#allocation3 + $0x8] sm:$0xc] %vm330_vm2, %v454_v63  ;;  %v455_v18 = vrot.slane %v452_v0, 4 }
  0xd7   : > { %v457_v2 = vsel %vm323_vm3, %v455_v18, %v456_v1 }
  0xd8   : > { %v458_v3 = vsel %vm325_vm10, %v452_v0, %v457_v2  ;;  %v466_v4 = vpop.permute.xlu1 %465  ;;  %v464_v5 = vpop.permute.xlu0 %463  ;;  %v1200_v6 = vld [vmem:[#allocation3 + $0x20] ss:$12 sps:$4 sm:$0xff]  }
  0xd9   : > { %461 = vst [vmem:[#allocation3] sm:$0xcc] %v458_v3  ;;  %v468_v7 = vrot.slane %v466_v4, 4  ;;  %474 = vst.msk [vmem:[#allocation3 + $0x14] sm:$0x3] %vm307_vm0, %v466_v4  ;;  %v467_v8 = vrot.slane %v464_v5, 4  ;;  %1112 = vmatpush3.bf16.msra.mxu1 %v1200_v6 }
  0xda   : > { %1113 = vmatprep.subr.bf16.mxu1 %v1327_v14  ;;  %v1205_v14 = vld [vmem:[#allocation4] sm:$0x3f]  }
  0xdb   : > { %v469_v9 = vsel %vm323_vm3, %v467_v8, %v468_v7 }
  0xdc   : > { %v470_v10 = vsel %vm339_vm11, %v464_v5, %v469_v9  ;;  %v478_v11 = vpop.permute.xlu1 %477  ;;  %v476_v12 = vpop.permute.xlu0 %475  ;;  %v1201_v13 = vld [vmem:[#allocation3 + $0x18] ss:$12 sps:$4 sm:$0xff]   ;;  %v1203_v15 = vld [vmem:[#allocation3 + $0x1c] ss:$12 sps:$4 sm:$0xff]  }
  0xdd   : > { %473 = vst [vmem:[#allocation3 + $0xc] sm:$0x33] %v470_v10  ;;  %v480_v16 = vrot.slane %v478_v11, 4  ;;  %486 = vst.msk [vmem:[#allocation3 + $0x14] sm:$0xc] %vm330_vm2, %v478_v11  ;;  %v479_v17 = vrot.slane %v476_v12, 4  ;;  %807 = vmatprep.subr.bf16.mxu0 %v1203_v15 }
  0xde   : > { %808 = vmatpush1.bf16.msra.mxu0 %v1201_v13 }
  0xdf   : > { %v481_v19 = vsel %vm323_vm3, %v479_v17, %v480_v16 }
  0xe0   : > { %v482_v20 = vsel %vm352_vm12, %v476_v12, %v481_v19 }
  0xe1   : > { %485 = vst [vmem:[#allocation3 + $0xc] sm:$0xcc] %v482_v20  ;;  %v928_v20 = vld [vmem:[#allocation3 + $0x20] sm:$0x3] }
  0xe4   : > { %v1204_v21 = vld [vmem:[#allocation3 + $0x8] ss:$12 sps:$4 sm:$0xff]  }
  0xe5   : > { %1114 = vmatpush3.bf16.msra.mxu1 %v1204_v21  ;;  %v931_v21 = vunpack.c.l.bf16 %v928_v20 }
  0xe8   : > { %v1206_v22 = vld [vmem:[#allocation3] ss:$12 sps:$4 sm:$0xff]   ;;  %v1208_v23 = vld [vmem:[#allocation3 + $0x4] ss:$12 sps:$4 sm:$0xff]   ;;  %1116 = vmatmul.mubr.msk.bf16.vlgmr.msra.gmra.mxu1 %vm616_vm13, %v1205_v14 }
  0xe9   : > { %809 = vmatprep.subr.bf16.mxu0 %v1208_v23  ;;  %v731_v30 = vpop.permute.xlu1 %730  ;;  %v564_v32 = vpop.permute.xlu0 %563 }
  0xea   : > { %810 = vmatpush1.bf16.msra.mxu0 %v1206_v22 }
  0xed   : > { %1083 = vmatmul.mubr.msk.bf16.vlgmr.msra.gmra.mxu0 %vm616_vm13, %v1205_v14  ;;  %v736_v57 = vpop.permute.xlu1 %735  ;;  %v569_v18 = vpop.permute.xlu0 %568 }
 0x189   : > { %v707_v24 = vpop.f32.mrf.mxu1 }
 0x18a   : > { %v708_v34 = vadd.f32 %v707_v24, %v564_v32 }
 0x18b   : > { %v1107_v25 = vpop.f32.mrf.mxu1 }
 0x18c   : > { %v927_v25 = vld [vmem:[#allocation3 + $0x18] sm:$0x33] }
 0x18d   : > { %v710_v26 = vpop.f32.mrf.mxu1 }
 0x18e   : > { %v664_v28 = vpop.f32.mrf.mxu0  ;;  %v711_v3 = vadd.f32 %v710_v26, %v569_v18 }
 0x18f   : > { %v1108_v27 = vpop.f32.mrf.mxu1  ;;  %v665_v42 = vadd.f32 %v664_v28, %v564_v32 }
 0x190   : > { %v666_v29 = vpop.f32.mrf.mxu0 }
 0x191   : > { %v667_v46 = vadd.f32 %v666_v29, %v564_v32  ;;  %v929_v29 = vunpack.c.l.bf16 %v927_v25 }
 0x192   : > { %v668_v31 = vpop.f32.mrf.mxu0 }
 0x193   : > { %v669_v11 = vadd.f32 %v668_v31, %v569_v18 }
 0x194   : > { %v670_v37 = vpop.f32.mrf.mxu0 }
 0x195   : > { %v671_v15 = vadd.f32 %v670_v37, %v569_v18 }
 0x1a8   : > { %v872_v33 = vpop.f32.mrf.mxu1 }
 0x1a9   : > { %v873_v35 = vadd.f32 %v872_v33, %v731_v30 }
 0x1aa   : > { %v1117_v36 = vpop.f32.mrf.mxu1 }
 0x1ab   : > { %v881_v38 = vadd.f32 %v873_v35, %v708_v34 }
 0x1ac   : > { %v875_v39 = vpop.f32.mrf.mxu1 }
 0x1ad   : > { %v1087_v40 = vmul.f32 -1.442695, %v881_v38  ;;  %v829_v41 = vpop.f32.mrf.mxu0  ;;  %v876_v59 = vadd.f32 %v875_v39, %v736_v57 }
 0x1ae   : > { %v830_v43 = vadd.f32 %v829_v41, %v731_v30  ;;  %v1118_v44 = vpop.f32.mrf.mxu1 }
 0x1af   : > { %1209 = vpow2.f32 %v1087_v40  ;;  %v831_v45 = vpop.f32.mrf.mxu0  ;;  %v905_v61 = vrot.slane %v876_v59, 4 }
 0x1b0   : > { %v879_v47 = vadd.f32 %v830_v43, %v665_v42  ;;  %v832_v48 = vadd.f32 %v831_v45, %v731_v30  ;;  %v930_v30 = vunpack.c.h.bf16 %v927_v25 }
 0x1b1   : > { %v833_v60 = vpop.f32.mrf.mxu0 }
 0x1b2   : > { %v1085_v49 = vmul.f32 -1.442695, %v879_v47  ;;  %v880_v50 = vadd.f32 %v832_v48, %v667_v46  ;;  %v834_v0 = vadd.f32 %v833_v60, %v736_v57 }
 0x1b3   : > { %v835_v62 = vpop.f32.mrf.mxu0 }
 0x1b4   : > { %1211 = vpow2.f32 %v1085_v49  ;;  %v1086_v51 = vmul.f32 -1.442695, %v880_v50  ;;  %v836_v2 = vadd.f32 %v835_v62, %v736_v57  ;;  %v903_v5 = vrot.slane %v834_v0, 4 }
 0x1b6   : > { %1213 = vpow2.f32 %v1086_v51  ;;  %v904_v9 = vrot.slane %v836_v2, 4 }
 0x1bc   : > { %v1210_v52 = vpop.eup %1209 }
 0x1bd   : > { %v893_v53 = vadd.f32 1.0, %v1210_v52 }
 0x1bf   : > { %1215 = vrcp.f32 %v893_v53 }
 0x1c1   : > { %v1212_v54 = vpop.eup %1211 }
 0x1c2   : > { %v891_v55 = vadd.f32 1.0, %v1212_v54 }
 0x1c3   : > { %v1214_v56 = vpop.eup %1213 }
 0x1c4   : > { %1217 = vrcp.f32 %v891_v55  ;;  %v892_v58 = vadd.f32 1.0, %v1214_v56 }
 0x1c6   : > { %1219 = vrcp.f32 %v892_v58 }
 0x1cc   : > { %v1216_v63 = vpop.eup %1215 }
 0x1cd   : > { %v911_v1 = vmul.f32 %v1216_v63, %v905_v61  ;;  %v934_v14 = vsub.f32 1.0, %v1216_v63  ;;  %v940_v24 = vmul.f32 %v1216_v63, %v931_v21 }
 0x1cf   : > { %v917_v4 = vrot.slane %v911_v1, 4 }
 0x1d1   : > { %v1218_v6 = vpop.eup %1217  ;;  %v923_v7 = vadd.f32 %v917_v4, %v711_v3 }
 0x1d2   : > { %v909_v8 = vmul.f32 %v1218_v6, %v903_v5  ;;  %v932_v27 = vsub.f32 1.0, %v1218_v6  ;;  %v938_v35 = vmul.f32 %v1218_v6, %v929_v29 }
 0x1d3   : > { %v1220_v10 = vpop.eup %1219  ;;  %1221 = vtanh.f32 %v923_v7 }
 0x1d4   : > { %v915_v12 = vrot.slane %v909_v8, 4  ;;  %v910_v13 = vmul.f32 %v1220_v10, %v904_v9  ;;  %v933_v31 = vsub.f32 1.0, %v1220_v10  ;;  %v939_v36 = vmul.f32 %v1220_v10, %v930_v30 }
 0x1d6   : > { %v921_v16 = vadd.f32 %v915_v12, %v669_v11  ;;  %v916_v17 = vrot.slane %v910_v13, 4 }
 0x1d8   : > { %1223 = vtanh.f32 %v921_v16  ;;  %v922_v19 = vadd.f32 %v916_v17, %v671_v15 }
 0x1da   : > { %1225 = vtanh.f32 %v922_v19 }
 0x1e0   : > { %v1222_v22 = vpop.eup %1221 }
 0x1e1   : > { %v937_v23 = vmul.f32 %v1222_v22, %v934_v14 }
 0x1e3   : > { %v943_v26 = vadd.f32 %v940_v24, %v937_v23 }
 0x1e5   : > { %v1224_v28 = vpop.eup %1223  ;;  %950 = vst.msk [vmem:[%s274_s15 + $0x8] sm:$0xf] %vm949_vm14, %v943_v26 }
 0x1e6   : > { %v935_v32 = vmul.f32 %v1224_v28, %v932_v27 }
 0x1e7   : > { %v1226_v33 = vpop.eup %1225 }
 0x1e8   : > { %v936_v34 = vmul.f32 %v1226_v33, %v933_v31  ;;  %v941_v37 = vadd.f32 %v938_v35, %v935_v32 }
 0x1ea   : > { %v942_v38 = vadd.f32 %v939_v36, %v936_v34 }
 0x1ec   : > { %v946_v39 = vcombine.low %v941_v37, %v942_v38 }
 0x1ee   : > { %948 = vst [vmem:[%s274_s15] sm:$0xff] %v946_v39 }
 0x1ef   : > { %1266 = shalt.err (!%p1263_p0)
}
 0x1f0   : > { %s1267_s10 = scalar_lea.hbm %s964_s20, 192  ;;  %s1271_s13 = scalar_lea.hbm %s1593_s6, 384 }
 0x1f1   : > { %p1268_p1 = scmp.ne.s32.totalorder %s964_s20, %s1267_s10  ;;  %p1272_p4 = scmp.lt.s32.totalorder %s964_s20, %s1593_s6 }
 0x1f2   : > { %p1273_p7 = scmp.lt.s32.totalorder %s1271_s13, %s1267_s10 }
 0x1f3   : > { %p1269_p2 = pnand %p1268_p1, %p1408_p5 }
 0x1f4   : > { %p1274_p8 = por %p1273_p7, %p1272_p4 }
 0x1f5   : > { %p1270_p3 = pneg %p1269_p2 }
 0x1f7   : > { %p1275_p6 = pnand %p1274_p8, %p1270_p3 }
 0x1f9   : > { %1278 = shalt.err (!%p1275_p6)
}
 0x1fa   : > { %1126 = dma.vmem_to_hbm [thread:$0]  (%p1408_p5), %s967_s17, 192, %s964_s20, %s952_s26  }
 0x1fb PF: > { %p1138_p9 = scmp.ge.s32.totalorder %s1317_s24, 2  ;;  %s978_s16 = sand.u32 1, %s1305_s21  }
 0x1fc   : > { %p1597_p10 = scmp.ne.s32.totalorder %s1595_s8, 0  ;;  %s979_s18 = scalar_lea.sflag [#allocation6], %s978_s16 }
 0x1fe   : > { %p1133_p11 = pnand %p1138_p9, %p1597_p10 }
 0x200   : > { %p1134_p12 = pneg %p1133_p11 }
 0x202   : > { %1300 = dma.done.wait (%p1134_p12), %s979_s18, 192  }
 0x203   : > { %1302 = vsyncadd (%p1134_p12), %s979_s18, 4294967104  ;;  %p17_p13 = scmp.ge.s32.totalorder %s1395_s27, 4   ;;  %s1598_s21 = smov %s1309_s22 }
 0x204   : > { %s1599_s22 = smov %s1313_s23  ;;  %s1600_s23 = smov %s1406_s30 }
 0x205   : > { %s1601_s24 = smov %s1395_s27  ;;  %19 = sbr.rel (!%p17_p13) target bundleno = 4 (0x4), region = 87 }
 0x20a   :  { %984 = vsyncpa [#allocation5], 1 }
 0x20b   :  { %986 = vsyncpa [#allocation5 + $0x1], 1 }
 0x20c   :  { %987 = vsyncpa [#allocation6], 1 }
 0x20d   :  { %989 = vsyncpa [#allocation6 + $0x1], 1 }

</bundles_post_ra>
